<compile_context>
chip_gen: v7x
topology: tpu7x:2x2x1
jax: 0.10.0
libtpu: 0.0.40
codegen_flags: <defaults>
</compile_context>

<pallas_src>
import functools

import jax
import jax.numpy as jnp
from jax import lax
from jax.experimental import pallas as pl
from jax.experimental.pallas import tpu as pltpu

LANE = 128  # TPU lane width; all matmul K/N dims are padded to this.


# ----------------------------------------------------------------------------
# The single fused kernel
# ----------------------------------------------------------------------------
def _fused_forward_kernel(pat_ref, w1_ref, b1_ref, w2_ref, b2_ref,
                          wf1_ref, bf1_ref, wf2_ref, bf2_ref, out_ref,
                          *, batch):
    """Whole forward pass in VMEM.

    Row layouts (all lane dims padded to 128):
      pat    : (8*5*B, 128)  rows = (d, h, wv, w0, b)   conv1 im2col patches
      pooled : (5*B,   128)  rows = (w0, b)
      y2     : (5*B,   128)  rows = (w0, b)
    """
    m = 5 * batch  # rows per pooling slab / per conv2 output slab

    # ---- conv1: im2col matmul + bias + ReLU --------------------------------
    y1 = jnp.dot(pat_ref[...], w1_ref[...], preferred_element_type=jnp.float32)
    y1 = jnp.maximum(y1 + b1_ref[...], 0.0)                       # (8*m, 128)

    # ---- MaxPool3d(2, 2): elementwise max over the 8 window slabs ----------
    pooled = y1[0:m]
    for s in range(1, 8):
        pooled = jnp.maximum(pooled, y1[s * m:(s + 1) * m])       # (m, 128)

    # ---- conv2 (3x3x3, pad=1) on spatial (1,1,5): only the centre kd=kh=1
    # taps hit non-padding data, so it is exactly 3 shifted matmuls. ---------
    zrow = jnp.zeros((batch, pooled.shape[1]), pooled.dtype)
    ppad = jnp.concatenate([zrow, pooled, zrow], axis=0)          # rows (w0+1, b)
    y2 = jnp.dot(ppad[0:m], w2_ref[0], preferred_element_type=jnp.float32)
    y2 = y2 + jnp.dot(ppad[batch:batch + m], w2_ref[1],
                      preferred_element_type=jnp.float32)
    y2 = y2 + jnp.dot(ppad[2 * batch:2 * batch + m], w2_ref[2],
                      preferred_element_type=jnp.float32)
    y2 = jnp.maximum(y2 + b2_ref[...], 0.0)                       # (m, 128)

    # ---- flatten + fc1 (PyTorch channel-major flatten is folded into wf1) --
    feat = jnp.concatenate(
        [y2[w0 * batch:(w0 + 1) * batch] for w0 in range(5)], axis=1)  # (B, 640)
    h = jnp.dot(feat, wf1_ref[...], preferred_element_type=jnp.float32)
    h = jnp.maximum(h + bf1_ref[...], 0.0)                        # (B, 128)

    # ---- fc2 ----------------------------------------------------------------
    out_ref[...] = (jnp.dot(h, wf2_ref[...], preferred_element_type=jnp.float32)
                    + bf2_ref[...])                               # (B, 128)


# ----------------------------------------------------------------------------
# One-time parameter preparation (re-index / lane-pad; keep out of the jit path)
# ----------------------------------------------------------------------------
def prepare_params(p):
    w1, b1, w2, b2 = p["w1"], p["b1"], p["w2"], p["b2"]
    wf1, bf1, wf2, bf2 = p["wf1"], p["bf1"], p["wf2"], p["bf2"]
    h1, c_in = w1.shape[0], w1.shape[1]          # 64, 3
    h2 = w2.shape[0]                             # 128
    h3, n_out = wf1.shape[0], wf2.shape[0]       # 50, 7
    k1 = c_in * 27
    assert k1 <= LANE and h1 <= LANE and h2 <= LANE and h3 <= LANE and n_out <= LANE
    assert wf1.shape[1] == h2 * 5, "architecture fixes post-pool spatial to (1,1,5)"

    f32 = jnp.float32
    # conv1 weight: (h1, c, 3,3,3) -> (c*27, h1) -> zero-padded (128, 128)
    w1m = w1.reshape(h1, k1).T.astype(f32)
    w1p = jnp.zeros((LANE, LANE), f32).at[:k1, :h1].set(w1m)
    b1p = jnp.zeros((1, LANE), f32).at[0, :h1].set(b1.astype(f32))
    # conv2: only the (kd=1, kh=1) taps matter (D=H=1 after pooling).
    w2c = jnp.transpose(w2[:, :, 1, 1, :], (2, 1, 0)).astype(f32)   # (3, h1, h2)
    w2p = jnp.zeros((3, LANE, LANE), f32).at[:, :h1, :h2].set(w2c)
    b2p = jnp.zeros((1, LANE), f32).at[0, :h2].set(b2.astype(f32))
    # fc1: re-index so the kernel's (w0-major, channel-minor) flatten matches
    # PyTorch's channel-major x.view(B, -1) flatten.
    wf1r = wf1.reshape(h3, h2, 5).transpose(2, 1, 0).astype(f32)    # (5, h2, h3)
    wf1p = (jnp.zeros((5, LANE, LANE), f32).at[:, :h2, :h3].set(wf1r)
            .reshape(5 * LANE, LANE))
    bf1p = jnp.zeros((1, LANE), f32).at[0, :h3].set(bf1.astype(f32))
    # fc2
    wf2p = jnp.zeros((LANE, LANE), f32).at[:h3, :n_out].set(wf2.T.astype(f32))
    bf2p = jnp.zeros((1, LANE), f32).at[0, :n_out].set(bf2.astype(f32))
    return dict(w1p=w1p, b1p=b1p, w2p=w2p, b2p=b2p,
                wf1p=wf1p, bf1p=bf1p, wf2p=wf2p, bf2p=bf2p)


# ----------------------------------------------------------------------------
# conv1 im2col (plain JAX on the tiny raw input; XLA fuses this into a few ops)
# ----------------------------------------------------------------------------
def _conv1_patch_matrix(x):
    """Lane-padded conv1 patches, restricted to pool-surviving positions
    (d,h in {0,1}, w in [0,10)).  Rows ordered (d, h, wv, w0, b); cols ordered
    (c, kd, kh, kw) to match the OIDHW weight flatten."""
    B, C, D, H, W = x.shape
    assert (D, H, W) == (3, 3, 11), "architecture is fixed by fc1.in_features=640"
    xp = jnp.pad(x.astype(jnp.float32),
                 ((0, 0), (0, 0), (1, 1), (1, 1), (1, 1)))        # (B, C, 5, 5, 13)
    slabs = []
    for kd in range(3):
        for kh in range(3):
            for kw in range(3):
                slabs.append(xp[:, :, kd:kd + 2, kh:kh + 2, kw:kw + 10])
    pat = jnp.stack(slabs, axis=-1)                   # (B, C, 2, 2, 10, 27)
    pat = pat.reshape(B, C, 2, 2, 5, 2, 27)           # split w -> (w0, wv)
    pat = pat.transpose(2, 3, 5, 4, 0, 1, 6)          # (d, h, wv, w0, b, c, K)
    pat = pat.reshape(8 * 5 * B, C * 27)
    return jnp.pad(pat, ((0, 0), (0, LANE - C * 27)))


# ----------------------------------------------------------------------------
# Forward pass
# ----------------------------------------------------------------------------
@functools.partial(jax.jit, static_argnames=("n_out",))
def conv_neural_network_forward(x, prep, *, n_out=7):
    B = x.shape[0]
    pat = _conv1_patch_matrix(x)                      # (40*B, 128)
    vmem = lambda: pl.BlockSpec(memory_space=pltpu.MemorySpace.VMEM)
    out = pl.pallas_call(
        functools.partial(_fused_forward_kernel, batch=B),
        out_shape=jax.ShapeDtypeStruct((B, LANE), jnp.float32),
        in_specs=[vmem() for _ in range(9)],
        out_specs=vmem(),
    )(pat, prep["w1p"], prep["b1p"], prep["w2p"], prep["b2p"],
      prep["wf1p"], prep["bf1p"], prep["wf2p"], prep["bf2p"])
    return out[:, :n_out]


# Pure-JAX reference for correctness checking.
def conv_neural_network_ref(x, p):
    def conv3d(x, w, b):
        y = lax.conv_general_dilated(
            x, w, window_strides=(1, 1, 1), padding=[(1, 1)] * 3,
            dimension_numbers=("NCDHW", "OIDHW", "NCDHW"))
        return y + b.reshape(1, -1, 1, 1, 1)

    y = jax.nn.relu(conv3d(x, p["w1"], p["b1"]))
    y = lax.reduce_window(y, -jnp.inf, lax.max,
                          window_dimensions=(1, 1, 2, 2, 2),
                          window_strides=(1, 1, 2, 2, 2), padding="VALID")
    y = jax.nn.relu(conv3d(y, p["w2"], p["b2"]))
    y = y.reshape(y.shape[0], -1)
    y = jax.nn.relu(y @ p["wf1"].T + p["bf1"])
    y = y @ p["wf2"].T + p["bf2"]
    return y


if __name__ == "__main__":
    key = jax.random.PRNGKey(0)
    ks = jax.random.split(key, 9)

    # Deterministic synthetic parameters (shapes from the module's __init__).
    params = {
        "w1": jax.random.normal(ks[0], (64, 3, 3, 3, 3), jnp.float32) * 0.05,
        "b1": jax.random.normal(ks[1], (64,), jnp.float32) * 0.05,
        "w2": jax.random.normal(ks[2], (128, 64, 3, 3, 3), jnp.float32) * 0.02,
        "b2": jax.random.normal(ks[3], (128,), jnp.float32) * 0.02,
        "wf1": jax.random.normal(ks[4], (50, 640), jnp.float32) * 0.02,
        "bf1": jax.random.normal(ks[5], (50,), jnp.float32) * 0.02,
        "wf2": jax.random.normal(ks[6], (7, 50), jnp.float32) * 0.05,
        "bf2": jax.random.normal(ks[7], (7,), jnp.float32) * 0.05,
    }

    # Input: NCDHW = (batch=2, channels=3, D=3, H=3, W=11), matching _to_linear=640.
    x = jax.random.normal(ks[8], (2, 3, 3, 3, 11), jnp.float32)

    prep = prepare_params(params)                 # one-time weight prep (not traced per call)
    out = conv_neural_network_forward(x, prep)
    out = jax.block_until_ready(out)
    assert out.shape == (2, 7), out.shape

    ref = jax.block_until_ready(conv_neural_network_ref(x, params))
    assert jnp.allclose(out, ref, rtol=1e-4, atol=1e-4), (out, ref)

    print("KERNEL_OK")
</pallas_src>

<mosaic_0001>
module attributes {stable_mosaic.version = 11 : i64} {
  func.func @_fused_forward_kernel(%arg0: memref<80x128xf32, #tpu.memory_space<vmem>>, %arg1: memref<128x128xf32, #tpu.memory_space<vmem>>, %arg2: memref<1x128xf32, #tpu.memory_space<vmem>>, %arg3: memref<3x128x128xf32, #tpu.memory_space<vmem>>, %arg4: memref<1x128xf32, #tpu.memory_space<vmem>>, %arg5: memref<640x128xf32, #tpu.memory_space<vmem>>, %arg6: memref<1x128xf32, #tpu.memory_space<vmem>>, %arg7: memref<128x128xf32, #tpu.memory_space<vmem>>, %arg8: memref<1x128xf32, #tpu.memory_space<vmem>>, %arg9: memref<2x128xf32, #tpu.memory_space<vmem>>) attributes {dimension_semantics = [], scalar_prefetch = 0 : i64, scratch_operands = 0 : i64, tpu.core_type = #tpu.core_type<tc>} {
    %c0 = arith.constant 0 : index
    %c0_0 = arith.constant 0 : index
    %0 = vector.load %arg0[%c0, %c0_0] : memref<80x128xf32, #tpu.memory_space<vmem>>, vector<80x128xf32>
    %c0_1 = arith.constant 0 : index
    %c0_2 = arith.constant 0 : index
    %1 = vector.load %arg1[%c0_1, %c0_2] : memref<128x128xf32, #tpu.memory_space<vmem>>, vector<128x128xf32>
    %cst = arith.constant dense<0.000000e+00> : vector<80x128xf32>
    %2 = tpu.matmul %0, %1, %cst {dimension_numbers = #tpu.dot_dimension_numbers<[1], [0], [0], [1], [0, 0, 1, 1], [], []>} : vector<80x128xf32>, vector<128x128xf32>, vector<80x128xf32> -> vector<80x128xf32>
    %c0_3 = arith.constant 0 : index
    %c0_4 = arith.constant 0 : index
    %3 = vector.load %arg2[%c0_3, %c0_4] : memref<1x128xf32, #tpu.memory_space<vmem>>, vector<1x128xf32>
    %4 = vector.broadcast %3 : vector<1x128xf32> to vector<80x128xf32>
    %5 = arith.addf %2, %4 : vector<80x128xf32>
    %cst_5 = arith.constant 0.000000e+00 : f32
    %6 = vector.broadcast %cst_5 : f32 to vector<80x128xf32>
    %7 = arith.maximumf %5, %6 : vector<80x128xf32>
    %8 = vector.extract_strided_slice %7 {offsets = [0, 0], sizes = [10, 128], strides = [1, 1]} : vector<80x128xf32> to vector<10x128xf32>
    %9 = vector.extract_strided_slice %7 {offsets = [10, 0], sizes = [10, 128], strides = [1, 1]} : vector<80x128xf32> to vector<10x128xf32>
    %10 = arith.maximumf %8, %9 : vector<10x128xf32>
    %11 = vector.extract_strided_slice %7 {offsets = [20, 0], sizes = [10, 128], strides = [1, 1]} : vector<80x128xf32> to vector<10x128xf32>
    %12 = arith.maximumf %10, %11 : vector<10x128xf32>
    %13 = vector.extract_strided_slice %7 {offsets = [30, 0], sizes = [10, 128], strides = [1, 1]} : vector<80x128xf32> to vector<10x128xf32>
    %14 = arith.maximumf %12, %13 : vector<10x128xf32>
    %15 = vector.extract_strided_slice %7 {offsets = [40, 0], sizes = [10, 128], strides = [1, 1]} : vector<80x128xf32> to vector<10x128xf32>
    %16 = arith.maximumf %14, %15 : vector<10x128xf32>
    %17 = vector.extract_strided_slice %7 {offsets = [50, 0], sizes = [10, 128], strides = [1, 1]} : vector<80x128xf32> to vector<10x128xf32>
    %18 = arith.maximumf %16, %17 : vector<10x128xf32>
    %19 = vector.extract_strided_slice %7 {offsets = [60, 0], sizes = [10, 128], strides = [1, 1]} : vector<80x128xf32> to vector<10x128xf32>
    %20 = arith.maximumf %18, %19 : vector<10x128xf32>
    %21 = vector.extract_strided_slice %7 {offsets = [70, 0], sizes = [10, 128], strides = [1, 1]} : vector<80x128xf32> to vector<10x128xf32>
    %22 = arith.maximumf %20, %21 : vector<10x128xf32>
    %cst_6 = arith.constant 0.000000e+00 : f32
    %23 = vector.broadcast %cst_6 : f32 to vector<2x128xf32>
    %24 = tpu.concatenate %23, %22, %23 in 0 : vector<2x128xf32>, vector<10x128xf32>, vector<2x128xf32> -> vector<14x128xf32>
    %25 = vector.extract_strided_slice %24 {offsets = [0, 0], sizes = [10, 128], strides = [1, 1]} : vector<14x128xf32> to vector<10x128xf32>
    %c0_7 = arith.constant 0 : index
    %c0_8 = arith.constant 0 : index
    %c0_9 = arith.constant 0 : index
    %26 = vector.load %arg3[%c0_7, %c0_8, %c0_9] : memref<3x128x128xf32, #tpu.memory_space<vmem>>, vector<1x128x128xf32>
    %27 = vector.shape_cast %26 : vector<1x128x128xf32> to vector<128x128xf32>
    %cst_10 = arith.constant dense<0.000000e+00> : vector<10x128xf32>
    %28 = tpu.matmul %25, %27, %cst_10 {dimension_numbers = #tpu.dot_dimension_numbers<[1], [0], [0], [1], [0, 0, 1, 1], [], []>} : vector<10x128xf32>, vector<128x128xf32>, vector<10x128xf32> -> vector<10x128xf32>
    %29 = vector.extract_strided_slice %24 {offsets = [2, 0], sizes = [10, 128], strides = [1, 1]} : vector<14x128xf32> to vector<10x128xf32>
    %c1 = arith.constant 1 : index
    %c0_11 = arith.constant 0 : index
    %c0_12 = arith.constant 0 : index
    %30 = vector.load %arg3[%c1, %c0_11, %c0_12] : memref<3x128x128xf32, #tpu.memory_space<vmem>>, vector<1x128x128xf32>
    %31 = vector.shape_cast %30 : vector<1x128x128xf32> to vector<128x128xf32>
    %cst_13 = arith.constant dense<0.000000e+00> : vector<10x128xf32>
    %32 = tpu.matmul %29, %31, %cst_13 {dimension_numbers = #tpu.dot_dimension_numbers<[1], [0], [0], [1], [0, 0, 1, 1], [], []>} : vector<10x128xf32>, vector<128x128xf32>, vector<10x128xf32> -> vector<10x128xf32>
    %33 = arith.addf %28, %32 : vector<10x128xf32>
    %34 = vector.extract_strided_slice %24 {offsets = [4, 0], sizes = [10, 128], strides = [1, 1]} : vector<14x128xf32> to vector<10x128xf32>
    %c2 = arith.constant 2 : index
    %c0_14 = arith.constant 0 : index
    %c0_15 = arith.constant 0 : index
    %35 = vector.load %arg3[%c2, %c0_14, %c0_15] : memref<3x128x128xf32, #tpu.memory_space<vmem>>, vector<1x128x128xf32>
    %36 = vector.shape_cast %35 : vector<1x128x128xf32> to vector<128x128xf32>
    %cst_16 = arith.constant dense<0.000000e+00> : vector<10x128xf32>
    %37 = tpu.matmul %34, %36, %cst_16 {dimension_numbers = #tpu.dot_dimension_numbers<[1], [0], [0], [1], [0, 0, 1, 1], [], []>} : vector<10x128xf32>, vector<128x128xf32>, vector<10x128xf32> -> vector<10x128xf32>
    %38 = arith.addf %33, %37 : vector<10x128xf32>
    %c0_17 = arith.constant 0 : index
    %c0_18 = arith.constant 0 : index
    %39 = vector.load %arg4[%c0_17, %c0_18] : memref<1x128xf32, #tpu.memory_space<vmem>>, vector<1x128xf32>
    %40 = vector.broadcast %39 : vector<1x128xf32> to vector<10x128xf32>
    %41 = arith.addf %38, %40 : vector<10x128xf32>
    %cst_19 = arith.constant 0.000000e+00 : f32
    %42 = vector.broadcast %cst_19 : f32 to vector<10x128xf32>
    %43 = arith.maximumf %41, %42 : vector<10x128xf32>
    %44 = vector.extract_strided_slice %43 {offsets = [0, 0], sizes = [2, 128], strides = [1, 1]} : vector<10x128xf32> to vector<2x128xf32>
    %45 = vector.extract_strided_slice %43 {offsets = [2, 0], sizes = [2, 128], strides = [1, 1]} : vector<10x128xf32> to vector<2x128xf32>
    %46 = vector.extract_strided_slice %43 {offsets = [4, 0], sizes = [2, 128], strides = [1, 1]} : vector<10x128xf32> to vector<2x128xf32>
    %47 = vector.extract_strided_slice %43 {offsets = [6, 0], sizes = [2, 128], strides = [1, 1]} : vector<10x128xf32> to vector<2x128xf32>
    %48 = vector.extract_strided_slice %43 {offsets = [8, 0], sizes = [2, 128], strides = [1, 1]} : vector<10x128xf32> to vector<2x128xf32>
    %49 = tpu.concatenate %44, %45, %46, %47, %48 in 1 : vector<2x128xf32>, vector<2x128xf32>, vector<2x128xf32>, vector<2x128xf32>, vector<2x128xf32> -> vector<2x640xf32>
    %c0_20 = arith.constant 0 : index
    %c0_21 = arith.constant 0 : index
    %50 = vector.load %arg5[%c0_20, %c0_21] : memref<640x128xf32, #tpu.memory_space<vmem>>, vector<640x128xf32>
    %cst_22 = arith.constant dense<0.000000e+00> : vector<2x128xf32>
    %51 = tpu.matmul %49, %50, %cst_22 {dimension_numbers = #tpu.dot_dimension_numbers<[1], [0], [0], [1], [0, 0, 1, 1], [], []>} : vector<2x640xf32>, vector<640x128xf32>, vector<2x128xf32> -> vector<2x128xf32>
    %c0_23 = arith.constant 0 : index
    %c0_24 = arith.constant 0 : index
    %52 = vector.load %arg6[%c0_23, %c0_24] : memref<1x128xf32, #tpu.memory_space<vmem>>, vector<1x128xf32>
    %53 = vector.broadcast %52 : vector<1x128xf32> to vector<2x128xf32>
    %54 = arith.addf %51, %53 : vector<2x128xf32>
    %cst_25 = arith.constant 0.000000e+00 : f32
    %55 = vector.broadcast %cst_25 : f32 to vector<2x128xf32>
    %56 = arith.maximumf %54, %55 : vector<2x128xf32>
    %c0_26 = arith.constant 0 : index
    %c0_27 = arith.constant 0 : index
    %57 = vector.load %arg7[%c0_26, %c0_27] : memref<128x128xf32, #tpu.memory_space<vmem>>, vector<128x128xf32>
    %cst_28 = arith.constant dense<0.000000e+00> : vector<2x128xf32>
    %58 = tpu.matmul %56, %57, %cst_28 {dimension_numbers = #tpu.dot_dimension_numbers<[1], [0], [0], [1], [0, 0, 1, 1], [], []>} : vector<2x128xf32>, vector<128x128xf32>, vector<2x128xf32> -> vector<2x128xf32>
    %c0_29 = arith.constant 0 : index
    %c0_30 = arith.constant 0 : index
    %59 = vector.load %arg8[%c0_29, %c0_30] : memref<1x128xf32, #tpu.memory_space<vmem>>, vector<1x128xf32>
    %60 = vector.broadcast %59 : vector<1x128xf32> to vector<2x128xf32>
    %61 = arith.addf %58, %60 : vector<2x128xf32>
    %c0_31 = arith.constant 0 : index
    %c0_32 = arith.constant 0 : index
    %62 = vector.load %arg9[%c0_31, %c0_32] : memref<2x128xf32, #tpu.memory_space<vmem>>, vector<2x128xf32>
    tpu.vector_store %arg9[%c0_31, %c0_32], %61 {strides = array<i32>} : memref<2x128xf32, #tpu.memory_space<vmem>>, vector<2x128xf32>,
    return
  }
}

</mosaic_0001>

<bundles_post_ra>
// kernel: conv_neural_network_forward.1
= control target key start
LH: loop header
LB: loop body
LE: loop exit
PB: predicated region body
PF: predicated region fallthrough
CT: control target
= control target key end

     0   :  { %s2327_s0 = inlined_call_operand.vmem [shape: f32[80,128], index: 0, kind: input, shape index: {}]   ;;  %s2328_s1 = inlined_call_operand.vmem [shape: f32[128,128], index: 1, kind: input, shape index: {}]   ;;  %s2329_s2 = inlined_call_operand.vmem [shape: f32[1,128], index: 2, kind: input, shape index: {}]   ;;  %s2330_s3 = inlined_call_operand.vmem [shape: f32[3,128,128], index: 3, kind: input, shape index: {}]   ;;  %s2331_s4 = inlined_call_operand.vmem [shape: f32[1,128], index: 4, kind: input, shape index: {}]   ;;  %s2332_s5 = inlined_call_operand.vmem [shape: f32[640,128], index: 5, kind: input, shape index: {}]   ;;  %s2333_s6 = inlined_call_operand.vmem [shape: f32[1,128], index: 6, kind: input, shape index: {}]   ;;  %s2334_s7 = inlined_call_operand.vmem [shape: f32[128,128], index: 7, kind: input, shape index: {}]   ;;  %s2335_s8 = inlined_call_operand.vmem [shape: f32[1,128], index: 8, kind: input, shape index: {}]   ;;  %s2336_s9 = inlined_call_operand.hbm [shape: f32[2,128], index: 9, kind: output, shape index: {}]  }
   0x1   :  { %v43_v0 = vld [vmem:[%s2328_s1] sm:$0xff]  ;;  %v44_v1 = vld [vmem:[%s2328_s1 + $0x8] sm:$0xff]  ;;  %v45_v2 = vld [vmem:[%s2328_s1 + $0x10] sm:$0xff] }
   0x2   :  { %v1413_v3 = vpack.c.bf16 %v44_v1, %v43_v0  ;;  %v46_v4 = vld [vmem:[%s2328_s1 + $0x18] sm:$0xff]  ;;  %v47_v6 = vld [vmem:[%s2328_s1 + $0x20] sm:$0xff]  ;;  %v48_v7 = vld [vmem:[%s2328_s1 + $0x28] sm:$0xff] }
   0x3   :  { %v1417_v5 = vpack.c.bf16 %v46_v4, %v45_v2  ;;  %v1421_v8 = vpack.c.bf16 %v48_v7, %v47_v6  ;;  %v33_v9 = vld [vmem:[%s2327_s0] sm:$0xff]  ;;  %v49_v10 = vld [vmem:[%s2328_s1 + $0x30] sm:$0xff]  ;;  %v50_v11 = vld [vmem:[%s2328_s1 + $0x38] sm:$0xff] }
   0x4   :  { %1414 = vmatprep.subr.bf16.mxu0 %v1413_v3  ;;  %1223 = vmatprep.mubr.f32.mxu0 %v33_v9 }
   0x5   :  { %1416 = vmatpush3.bf16.msra.mxu0 %v1413_v3 }
   0x6   :  { %1418 = vmatprep.subr.bf16.mxu0 %v1417_v5 }
   0x9   :  { %1420 = vmatpush3.bf16.msra.mxu0 %v1417_v5 }
   0xa   :  { %14 = vsyncpa [#allocation3], 0  ;;  %1422 = vmatprep.subr.bf16.mxu0 %v1421_v8  ;;  %v1425_v12 = vpack.c.bf16 %v50_v11, %v49_v10  ;;  %v51_v13 = vld [vmem:[%s2328_s1 + $0x40] sm:$0xff]  ;;  %v52_v14 = vld [vmem:[%s2328_s1 + $0x48] sm:$0xff]  ;;  %vm202_vm0 = vcmask 1043456   ;;  %vm193_vm1 = vcmask 1045504  }
   0xb   :  { %v1429_v15 = vpack.c.bf16 %v52_v14, %v51_v13  ;;  %v53_v16 = vld [vmem:[%s2328_s1 + $0x50] sm:$0xff]  ;;  %v54_v17 = vld [vmem:[%s2328_s1 + $0x58] sm:$0xff]  ;;  %v55_v19 = vld [vmem:[%s2328_s1 + $0x60] sm:$0xff]  ;;  %vm211_vm2 = vcmask 1041408   ;;  %vm1686_vm4 = vmmov 0   ;;  %s1688_s15 = smov [#allocation2]  }
   0xc   :  { %v1433_v18 = vpack.c.bf16 %v54_v17, %v53_v16  ;;  %v56_v20 = vld [vmem:[%s2328_s1 + $0x68] sm:$0xff]  ;;  %v57_v22 = vld [vmem:[%s2328_s1 + $0x70] sm:$0xff]  ;;  %v58_v23 = vld [vmem:[%s2328_s1 + $0x78] sm:$0xff]  ;;  %s960_s16 = sshll.u32 %s1688_s15, 4  ;;  %s961_s16 = int_to_ptr.vmem [resolvable:$true] %s960_s16 }
   0xd   :  { %1424 = vmatpush3.bf16.msra.mxu0 %v1421_v8  ;;  %v1437_v21 = vpack.c.bf16 %v56_v20, %v55_v19  ;;  %v1441_v24 = vpack.c.bf16 %v58_v23, %v57_v22  ;;  %v34_v25 = vld [vmem:[%s2327_s0 + $0x8] sm:$0xff]  ;;  %v35_v26 = vld [vmem:[%s2327_s0 + $0x10] sm:$0xff]  ;;  %v36_v27 = vld [vmem:[%s2327_s0 + $0x18] sm:$0xff]  ;;  %p1666_p1 = scmp.lt.s32.totalorder %s961_s16, %s961_s16 }
   0xe   :  { %1426 = vmatprep.subr.bf16.mxu0 %v1425_v12  ;;  %v37_v28 = vld [vmem:[%s2327_s0 + $0x20] sm:$0xff]  ;;  %v38_v29 = vld [vmem:[%s2327_s0 + $0x28] sm:$0xff]  ;;  %v39_v30 = vld [vmem:[%s2327_s0 + $0x30] sm:$0xff] }
   0xf   :  { %v40_v31 = vld [vmem:[%s2327_s0 + $0x38] sm:$0xff]  ;;  %v41_v32 = vld [vmem:[%s2327_s0 + $0x40] sm:$0xff]  ;;  %v42_v33 = vld [vmem:[%s2327_s0 + $0x48] sm:$0xff] }
  0x10   :  { %v969_v34 = vld [vmem:[%s2330_s3 + $0x80] sm:$0xff]  ;;  %v970_v35 = vld [vmem:[%s2330_s3 + $0x88] sm:$0xff]  ;;  %v971_v37 = vld [vmem:[%s2330_s3 + $0x90] sm:$0xff] }
  0x11   :  { %1428 = vmatpush3.bf16.msra.mxu0 %v1425_v12  ;;  %v1445_v36 = vpack.c.bf16 %v970_v35, %v969_v34  ;;  %v972_v38 = vld [vmem:[%s2330_s3 + $0x98] sm:$0xff]  ;;  %v973_v40 = vld [vmem:[%s2330_s3 + $0xa0] sm:$0xff]  ;;  %v974_v41 = vld [vmem:[%s2330_s3 + $0xa8] sm:$0xff] }
  0x12   :  { %1430 = vmatprep.subr.bf16.mxu0 %v1429_v15  ;;  %v1449_v39 = vpack.c.bf16 %v972_v38, %v971_v37  ;;  %v1453_v42 = vpack.c.bf16 %v974_v41, %v973_v40  ;;  %v975_v43 = vld [vmem:[%s2330_s3 + $0xb0] sm:$0xff]  ;;  %v976_v44 = vld [vmem:[%s2330_s3 + $0xb8] sm:$0xff]  ;;  %v977_v46 = vld [vmem:[%s2330_s3 + $0xc0] sm:$0xff] }
  0x13   :  { %1446 = vmatprep.subr.bf16.mxu1 %v1445_v36  ;;  %v1457_v45 = vpack.c.bf16 %v976_v44, %v975_v43  ;;  %v978_v47 = vld [vmem:[%s2330_s3 + $0xc8] sm:$0xff]  ;;  %v979_v49 = vld [vmem:[%s2330_s3 + $0xd0] sm:$0xff]  ;;  %v980_v50 = vld [vmem:[%s2330_s3 + $0xd8] sm:$0xff] }
  0x14   :  { %1448 = vmatpush3.bf16.msra.mxu1 %v1445_v36  ;;  %v1461_v48 = vpack.c.bf16 %v978_v47, %v977_v46  ;;  %v1465_v51 = vpack.c.bf16 %v980_v50, %v979_v49  ;;  %v981_v52 = vld [vmem:[%s2330_s3 + $0xe0] sm:$0xff]  ;;  %v982_v53 = vld [vmem:[%s2330_s3 + $0xe8] sm:$0xff]  ;;  %v983_v55 = vld [vmem:[%s2330_s3 + $0xf0] sm:$0xff] }
  0x15   :  { %1432 = vmatpush3.bf16.msra.mxu0 %v1429_v15  ;;  %1450 = vmatprep.subr.bf16.mxu1 %v1449_v39  ;;  %v1469_v54 = vpack.c.bf16 %v982_v53, %v981_v52  ;;  %v984_v56 = vld [vmem:[%s2330_s3 + $0xf8] sm:$0xff]  ;;  %v255_v58 = vld [vmem:[%s2330_s3] sm:$0xff]  ;;  %v256_v59 = vld [vmem:[%s2330_s3 + $0x8] sm:$0xff] }
  0x16   :  { %1434 = vmatprep.subr.bf16.mxu0 %v1433_v18  ;;  %v1473_v57 = vpack.c.bf16 %v984_v56, %v983_v55  ;;  %v1871_v60 = vpack.c.bf16 %v256_v59, %v255_v58  ;;  %v578_v61 = vld [vmem:[%s2332_s5 + $0x80] sm:$0xff]  ;;  %v579_v62 = vld [vmem:[%s2332_s5 + $0x88] sm:$0xff]  ;;  %v580_v2 = vld [vmem:[%s2332_s5 + $0x90] sm:$0xff] }
  0x17   :  { %v562_v63 = vld [vmem:[%s2332_s5] sm:$0xff]  ;;  %v1541_v0 = vpack.c.bf16 %v579_v62, %v578_v61  ;;  %v563_v1 = vld [vmem:[%s2332_s5 + $0x8] sm:$0xff]  ;;  %v581_v3 = vld [vmem:[%s2332_s5 + $0x98] sm:$0xff] }
  0x18   :  { %1452 = vmatpush3.bf16.msra.mxu1 %v1449_v39  ;;  %v1543_v4 = vpack.c.bf16 %v563_v1, %v562_v63  ;;  %v1545_v5 = vpack.c.bf16 %v581_v3, %v580_v2  ;;  %v564_v6 = vld [vmem:[%s2332_s5 + $0x10] sm:$0xff]  ;;  %v565_v7 = vld [vmem:[%s2332_s5 + $0x18] sm:$0xff]  ;;  %v582_v8 = vld [vmem:[%s2332_s5 + $0xa0] sm:$0xff] }
  0x19   :  { %1436 = vmatpush3.bf16.msra.mxu0 %v1433_v18  ;;  %1454 = vmatprep.subr.bf16.mxu1 %v1453_v42  ;;  %v583_v9 = vld [vmem:[%s2332_s5 + $0xa8] sm:$0xff]  ;;  %v1547_v10 = vpack.c.bf16 %v565_v7, %v564_v6  ;;  %v566_v12 = vld [vmem:[%s2332_s5 + $0x20] sm:$0xff]  ;;  %v584_v14 = vld [vmem:[%s2332_s5 + $0xb0] sm:$0xff] }
  0x1a   :  { %1438 = vmatprep.subr.bf16.mxu0 %v1437_v21  ;;  %v1549_v11 = vpack.c.bf16 %v583_v9, %v582_v8  ;;  %v567_v13 = vld [vmem:[%s2332_s5 + $0x28] sm:$0xff]  ;;  %v585_v15 = vld [vmem:[%s2332_s5 + $0xb8] sm:$0xff]  ;;  %v568_v18 = vld [vmem:[%s2332_s5 + $0x30] sm:$0xff] }
  0x1b   :  { %v1551_v16 = vpack.c.bf16 %v567_v13, %v566_v12  ;;  %v1553_v17 = vpack.c.bf16 %v585_v15, %v584_v14  ;;  %v569_v19 = vld [vmem:[%s2332_s5 + $0x38] sm:$0xff]  ;;  %v586_v20 = vld [vmem:[%s2332_s5 + $0xc0] sm:$0xff]  ;;  %vm985_vm3 = vmneg %vm211_vm2 }
  0x1c   :  { %1456 = vmatpush3.bf16.msra.mxu1 %v1453_v42  ;;  %v1555_v22 = vpack.c.bf16 %v569_v19, %v568_v18 }
  0x1d   :  { %1440 = vmatpush3.bf16.msra.mxu0 %v1437_v21  ;;  %1458 = vmatprep.subr.bf16.mxu1 %v1457_v45  ;;  %v587_v21 = vld [vmem:[%s2332_s5 + $0xc8] sm:$0xff] }
  0x1e   :  { %1442 = vmatprep.subr.bf16.mxu0 %v1441_v24  ;;  %v1557_v23 = vpack.c.bf16 %v587_v21, %v586_v20 }
  0x20   :  { %1460 = vmatpush3.bf16.msra.mxu1 %v1457_v45 }
  0x21   :  { %1444 = vmatpush3.bf16.msra.mxu0 %v1441_v24  ;;  %1462 = vmatprep.subr.bf16.mxu1 %v1461_v48  ;;  %v570_v24 = vld [vmem:[%s2332_s5 + $0x40] sm:$0xff] }
  0x22   :  { %1542 = vmatprep.subr.bf16.mxu0 %v1541_v0 }
  0x24   :  { %1224 = vmatmul.mubr.f32.vlgmr.msra.gmra.mrb[0].mxu0 %v34_v25  ;;  %1464 = vmatpush3.bf16.msra.mxu1 %v1461_v48  ;;  %v571_v25 = vld [vmem:[%s2332_s5 + $0x48] sm:$0xff] }
  0x25   :  { %1226 = vmatprep.mubr.f32.mxu0 %v35_v26  ;;  %1466 = vmatprep.subr.bf16.mxu1 %v1465_v51  ;;  %v588_v26 = vld [vmem:[%s2332_s5 + $0xd0] sm:$0xff] }
  0x26   :  { %1544 = vmatpush3.bf16.msra.mxu0 %v1543_v4 }
  0x27   :  { %1546 = vmatprep.subr.bf16.mxu0 %v1545_v5 }
  0x28   :  { %1227 = vmatmul.mubr.f32.gmra.mrb[2].mxu0 %v36_v27  ;;  %1468 = vmatpush3.bf16.msra.mxu1 %v1465_v51  ;;  %v589_v27 = vld [vmem:[%s2332_s5 + $0xd8] sm:$0xff] }
  0x29   :  { %1229 = vmatprep.mubr.f32.mxu0 %v37_v28  ;;  %1470 = vmatprep.subr.bf16.mxu1 %v1469_v54  ;;  %v1559_v28 = vpack.c.bf16 %v571_v25, %v570_v24 }
  0x2a   :  { %1548 = vmatpush3.bf16.msra.mxu0 %v1547_v10 }
  0x2b   :  { %1550 = vmatprep.subr.bf16.mxu0 %v1549_v11 }
  0x2c   :  { %1230 = vmatmul.mubr.f32.gmra.mrb[4].mxu0 %v38_v29  ;;  %1472 = vmatpush3.bf16.msra.mxu1 %v1469_v54  ;;  %v1561_v29 = vpack.c.bf16 %v589_v27, %v588_v26 }
  0x2d   :  { %1232 = vmatprep.mubr.f32.mxu0 %v39_v30  ;;  %1474 = vmatprep.subr.bf16.mxu1 %v1473_v57  ;;  %v572_v30 = vld [vmem:[%s2332_s5 + $0x50] sm:$0xff] }
  0x2e   :  { %1552 = vmatpush3.bf16.msra.mxu0 %v1551_v16 }
  0x2f   :  { %1554 = vmatprep.subr.bf16.mxu0 %v1553_v17 }
  0x30   :  { %1233 = vmatmul.mubr.f32.gmra.mrb[6].mxu0 %v40_v31  ;;  %1476 = vmatpush3.bf16.msra.mxu1 %v1473_v57  ;;  %v573_v31 = vld [vmem:[%s2332_s5 + $0x58] sm:$0xff] }
  0x31   :  { %1235 = vmatprep.mubr.f32.mxu0 %v41_v32  ;;  %1478 = vmatprep.subr.bf16.mxu1 %v1871_v60  ;;  %v1563_v32 = vpack.c.bf16 %v573_v31, %v572_v30 }
  0x32   :  { %1556 = vmatpush3.bf16.msra.mxu0 %v1555_v22 }
  0x33   :  { %1558 = vmatprep.subr.bf16.mxu0 %v1557_v23 }
  0x34   :  { %1236 = vmatmul.mubr.f32.gmra.mrb[8].mxu0 %v42_v33  ;;  %v968_v33 = vld [vmem:[%s2329_s2] ss:$0 sm:$0xff] }
  0x36   :  { %1560 = vmatpush3.bf16.msra.mxu0 %v1559_v28 }
  0x37   :  { %1562 = vmatprep.subr.bf16.mxu0 %v1561_v29 }
  0x3a   :  { %1564 = vmatpush3.bf16.msra.mxu0 %v1563_v32 }
  0xf7   :  { %v1225_v34 = vpop.f32.mrb[0].mxu0 }
  0xf8   :  { %v132_v35 = vpop.f32.mrb[1].mxu0  ;;  %v138_v36 = vadd.f32 %v1225_v34, %v968_v33 }
  0xf9   :  { %v133_v42 = vadd.f32 %v968_v33, %v132_v35 }
  0xfa   :  { %v182_v40 = vmax.f32 %v138_v36, 0.0 }
  0xfb   :  { %v1228_v37 = vpop.f32.mrb[2].mxu0  ;;  %v181_v52 = vmax.f32 %v133_v42, 0.0 }
  0xfc   :  { %v148_v38 = vadd.f32 %v1228_v37, %v968_v33  ;;  %v142_v39 = vpop.f32.mrb[3].mxu0  ;;  %v194_v48 = vrot.slane %v182_v40, 2 }
  0xfd   :  { %v143_v41 = vadd.f32 %v968_v33, %v142_v39  ;;  %v257_v39 = vld [vmem:[%s2330_s3 + $0x10] sm:$0xff] }
  0xfe   :  { %v184_v43 = vmax.f32 %v148_v38, 0.0 }
  0xff   :  { %v183_v44 = vmax.f32 %v143_v41, 0.0  ;;  %v1231_v45 = vpop.f32.mrb[4].mxu0 }
 0x100   :  { %v204_v46 = vrot.slane %v184_v43, 4  ;;  %v152_v47 = vpop.f32.mrb[5].mxu0  ;;  %v158_v58 = vadd.f32 %v1231_v45, %v968_v33  ;;  %v212_v63 = vrot.slane %v184_v43, 6 }
 0x101   :  { %v195_v49 = vrot.slane %v183_v44, 2  ;;  %v203_v50 = vrot.slane %v183_v44, 4  ;;  %v153_v51 = vadd.f32 %v968_v33, %v152_v47  ;;  %v259_v47 = vld [vmem:[%s2330_s3 + $0x20] sm:$0xff] }
 0x102   :  { %v186_v9 = vmax.f32 %v158_v58, 0.0  ;;  %v267_v58 = vld [vmem:[%s2330_s3 + $0x60] sm:$0xff] }
 0x103   :  { %v200_v53 = vmax.f32 %v182_v40, %v195_v49  ;;  %v205_v54 = vsel %vm202_vm0, %v203_v50, %v204_v46  ;;  %v185_v55 = vmax.f32 %v153_v51, 0.0  ;;  %v1234_v56 = vpop.f32.mrb[6].mxu0  ;;  %v196_v57 = vsel %vm193_vm1, %v194_v48, %v195_v49  ;;  %v258_v40 = vld [vmem:[%s2330_s3 + $0x18] sm:$0xff]  ;;  %v260_v48 = vld [vmem:[%s2330_s3 + $0x28] sm:$0xff]  ;;  %v261_v50 = vld [vmem:[%s2330_s3 + $0x30] sm:$0xff] }
 0x104   :  { %v168_v59 = vadd.f32 %v1234_v56, %v968_v33  ;;  %v162_v61 = vpop.f32.mrb[7].mxu0  ;;  %v199_v62 = vmax.f32 %v181_v52, %v196_v57  ;;  %v1481_v45 = vpack.c.bf16 %v258_v40, %v257_v39  ;;  %v1485_v49 = vpack.c.bf16 %v260_v48, %v259_v47  ;;  %v262_v51 = vld [vmem:[%s2330_s3 + $0x38] sm:$0xff]  ;;  %v594_v47 = vld [vmem:[%s2332_s5 + $0x100] sm:$0xff]  ;;  %v595_v48 = vld [vmem:[%s2332_s5 + $0x108] sm:$0xff] }
 0x105   :  { %v209_v0 = vmax.f32 %v200_v53, %v204_v46  ;;  %v213_v1 = vrot.slane %v185_v55, 6  ;;  %v163_v2 = vadd.f32 %v968_v33, %v162_v61  ;;  %v1489_v52 = vpack.c.bf16 %v262_v51, %v261_v50  ;;  %v263_v53 = vld [vmem:[%s2330_s3 + $0x40] sm:$0xff]  ;;  %v265_v55 = vld [vmem:[%s2330_s3 + $0x50] sm:$0xff]  ;;  %v266_v56 = vld [vmem:[%s2330_s3 + $0x58] sm:$0xff] }
 0x106   :  { %v188_v3 = vmax.f32 %v168_v59, 0.0  ;;  %v208_v4 = vmax.f32 %v199_v62, %v205_v54  ;;  %v1497_v57 = vpack.c.bf16 %v266_v56, %v265_v55  ;;  %v268_v59 = vld [vmem:[%s2330_s3 + $0x68] sm:$0xff]  ;;  %v269_v62 = vld [vmem:[%s2330_s3 + $0x70] sm:$0xff]  ;;  %v1685_v40 = vmov 0.0|0.0   ;;  %v613_v51 = vld [vmem:[%s2332_s5 + $0x198] sm:$0xff] }
 0x107   :  { %v214_v5 = vsel %vm211_vm2, %v212_v63, %v213_v1  ;;  %v218_v6 = vmax.f32 %v209_v0, %v213_v1  ;;  %v187_v7 = vmax.f32 %v163_v2, 0.0  ;;  %v1237_v8 = vpop.f32.mrb[8].mxu0  ;;  %v1501_v61 = vpack.c.bf16 %v268_v59, %v267_v58  ;;  %v270_v63 = vld [vmem:[%s2330_s3 + $0x78] sm:$0xff]  ;;  %v988_v1 = vld [vmem:[%s2330_s3 + $0x100] sm:$0xff]  ;;  %v989_v2 = vld [vmem:[%s2330_s3 + $0x108] sm:$0xff] }
 0x108   :  { %v224_v10 = vrot.slane %v188_v3, 2  ;;  %v178_v11 = vadd.f32 %v1237_v8, %v968_v33  ;;  %v172_v12 = vpop.f32.mrb[9].mxu0  ;;  %v217_v13 = vmax.f32 %v208_v4, %v214_v5  ;;  %v231_v24 = vrot.slane %v188_v3, 4  ;;  %v990_v4 = vld [vmem:[%s2330_s3 + $0x110] sm:$0xff]  ;;  %v991_v5 = vld [vmem:[%s2330_s3 + $0x118] sm:$0xff]  ;;  %v993_v8 = vld [vmem:[%s2330_s3 + $0x128] sm:$0xff] }
 0x109   :  { %v220_v14 = vmax.f32 %v218_v6, %v187_v7  ;;  %v223_v15 = vrot.slane %v187_v7, 2  ;;  %v173_v16 = vadd.f32 %v968_v33, %v172_v12  ;;  %v1505_v0 = vpack.c.bf16 %v270_v63, %v269_v62  ;;  %v992_v7 = vld [vmem:[%s2330_s3 + $0x120] sm:$0xff]  ;;  %v612_v50 = vld [vmem:[%s2332_s5 + $0x190] sm:$0xff]  ;;  %v597_v55 = vld [vmem:[%s2332_s5 + $0x118] sm:$0xff] }
 0x10a   :  { %v190_v17 = vmax.f32 %v178_v11, 0.0  ;;  %v219_v18 = vmax.f32 %v217_v13, %v186_v9  ;;  %v1509_v3 = vpack.c.bf16 %v989_v2, %v988_v1  ;;  %v1513_v6 = vpack.c.bf16 %v991_v5, %v990_v4  ;;  %v995_v11 = vld [vmem:[%s2330_s3 + $0x138] sm:$0xff]  ;;  %v996_v13 = vld [vmem:[%s2330_s3 + $0x140] sm:$0xff]  ;;  %v615_v58 = vld [vmem:[%s2332_s5 + $0x1a8] sm:$0xff] }
 0x10b   :  { %v229_v19 = vmax.f32 %v220_v14, %v224_v10  ;;  %v189_v20 = vmax.f32 %v173_v16, 0.0  ;;  %v225_v21 = vsel %vm193_vm1, %v223_v15, %v224_v10  ;;  %v1517_v9 = vpack.c.bf16 %v993_v8, %v992_v7  ;;  %v994_v10 = vld [vmem:[%s2330_s3 + $0x130] sm:$0xff]  ;;  %v997_v14 = vld [vmem:[%s2330_s3 + $0x148] sm:$0xff]  ;;  %v598_v62 = vld [vmem:[%s2332_s5 + $0x120] sm:$0xff] }
 0x10c   :  { %v240_v22 = vrot.slane %v190_v17, 6  ;;  %v228_v23 = vmax.f32 %v219_v18, %v225_v21  ;;  %v1521_v12 = vpack.c.bf16 %v995_v11, %v994_v10  ;;  %v1525_v15 = vpack.c.bf16 %v997_v14, %v996_v13  ;;  %v998_v16 = vld [vmem:[%s2330_s3 + $0x150] sm:$0xff]  ;;  %v999_v17 = vld [vmem:[%s2330_s3 + $0x158] sm:$0xff]  ;;  %v599_v63 = vld [vmem:[%s2332_s5 + $0x128] sm:$0xff] }
 0x10d   :  { %v232_v25 = vrot.slane %v189_v20, 4  ;;  %v239_v26 = vrot.slane %v189_v20, 6  ;;  %v1529_v18 = vpack.c.bf16 %v999_v17, %v998_v16  ;;  %v1001_v20 = vld [vmem:[%s2330_s3 + $0x168] sm:$0xff]  ;;  %v617_v1 = vld [vmem:[%s2332_s5 + $0x1b8] sm:$0xff]  ;;  %v1583_v2 = vpack.c.bf16 %v599_v63, %v598_v62  ;;  %v600_v4 = vld [vmem:[%s2332_s5 + $0x130] sm:$0xff] }
 0x10e   :  { %v601_v5 = vld [vmem:[%s2332_s5 + $0x138] sm:$0xff]  ;;  %v619_v7 = vld [vmem:[%s2332_s5 + $0x1c8] sm:$0xff]  ;;  %v602_v10 = vld [vmem:[%s2332_s5 + $0x140] sm:$0xff] }
 0x10f   :  { %v233_v27 = vsel %vm202_vm0, %v231_v24, %v232_v25  ;;  %v237_v28 = vmax.f32 %v229_v19, %v232_v25  ;;  %v241_v29 = vsel %vm211_vm2, %v239_v26, %v240_v22  ;;  %v1000_v19 = vld [vmem:[%s2330_s3 + $0x160] sm:$0xff]  ;;  %v591_v26 = vld [vmem:[%s2332_s5 + $0xe8] sm:$0xff]  ;;  %v1587_v8 = vpack.c.bf16 %v601_v5, %v600_v4  ;;  %v621_v13 = vld [vmem:[%s2332_s5 + $0x1d8] sm:$0xff] }
 0x110   :  { %v236_v30 = vmax.f32 %v228_v23, %v233_v27  ;;  %v1533_v21 = vpack.c.bf16 %v1001_v20, %v1000_v19  ;;  %v1003_v23 = vld [vmem:[%s2330_s3 + $0x178] sm:$0xff]  ;;  %v590_v25 = vld [vmem:[%s2332_s5 + $0xe0] sm:$0xff]  ;;  %v603_v11 = vld [vmem:[%s2332_s5 + $0x148] sm:$0xff] }
 0x111   :  { %v245_v31 = vmax.f32 %v237_v28, %v240_v22  ;;  %v1002_v22 = vld [vmem:[%s2330_s3 + $0x170] sm:$0xff]  ;;  %v1565_v27 = vpack.c.bf16 %v591_v26, %v590_v25  ;;  %v574_v28 = vld [vmem:[%s2332_s5 + $0x60] sm:$0xff]  ;;  %v1591_v14 = vpack.c.bf16 %v603_v11, %v602_v10  ;;  %v605_v17 = vld [vmem:[%s2332_s5 + $0x158] sm:$0xff] }
 0x112   :  { %v244_v32 = vmax.f32 %v236_v30, %v241_v29  ;;  %v1537_v24 = vpack.c.bf16 %v1003_v23, %v1002_v22  ;;  %v575_v29 = vld [vmem:[%s2332_s5 + $0x68] sm:$0xff]  ;;  %v604_v16 = vld [vmem:[%s2332_s5 + $0x150] sm:$0xff]  ;;  %v606_v22 = vld [vmem:[%s2332_s5 + $0x160] sm:$0xff] }
 0x113   :  { %v249_v33 = vrot.slane %v245_v31, 6  ;;  %v1567_v30 = vpack.c.bf16 %v575_v29, %v574_v28  ;;  %1566 = vmatprep.subr.bf16.mxu0 %v1565_v27  ;;  %v592_v31 = vld [vmem:[%s2332_s5 + $0xf0] sm:$0xff]  ;;  %v623_v19 = vld [vmem:[%s2332_s5 + $0x1e8] sm:$0xff]  ;;  %v1595_v20 = vpack.c.bf16 %v605_v17, %v604_v16  ;;  %v625_v25 = vld [vmem:[%s2332_s5 + $0x1f8] sm:$0xff] }
 0x114   :  { %v248_v34 = vrot.slane %v244_v32, 6  ;;  %v593_v32 = vld [vmem:[%s2332_s5 + $0xf8] sm:$0xff]  ;;  %v607_v23 = vld [vmem:[%s2332_s5 + $0x168] sm:$0xff]  ;;  %v608_v28 = vld [vmem:[%s2332_s5 + $0x170] sm:$0xff] }
 0x115   :  { %1568 = vmatpush3.bf16.msra.mxu0 %v1567_v30  ;;  %v1599_v26 = vpack.c.bf16 %v607_v23, %v606_v22  ;;  %v609_v29 = vld [vmem:[%s2332_s5 + $0x178] sm:$0xff] }
 0x116   :  { %v250_v35 = vsel %vm211_vm2, %v248_v34, %v249_v33  ;;  %v253_v36 = vsel %vm211_vm2, 0.0, %v248_v34  ;;  %v1569_v33 = vpack.c.bf16 %v593_v32, %v592_v31  ;;  %v1603_v30 = vpack.c.bf16 %v609_v29, %v608_v28  ;;  %v626_v31 = vld [vmem:[%s2332_s5 + $0x200] sm:$0xff]  ;;  %v627_v32 = vld [vmem:[%s2332_s5 + $0x208] sm:$0xff]  ;;  %v863_v63 = vld [vmem:[%s2334_s7 + $0x18] sm:$0xff] }
 0x117   :  { %v1958_v37 = vsel %vm202_vm0, %v250_v35, 0.0  ;;  %v290_v38 = vrot.slane %v253_v36, 2  ;;  %v462_v41 = vrot.slane %v253_v36, 4  ;;  %v867_v4 = vld [vmem:[%s2334_s7 + $0x38] sm:$0xff] }
 0x118   :  { %v291_v42 = vrot.slane %v1958_v37, 2  ;;  %v463_v43 = vrot.slane %v1958_v37, 4  ;;  %1570 = vmatprep.subr.bf16.mxu0 %v1569_v33  ;;  %v610_v37 = vld [vmem:[%s2332_s5 + $0x180] sm:$0xff]  ;;  %v1606_v33 = vpack.c.bf16 %v627_v32, %v626_v31  ;;  %v871_v10 = vld [vmem:[%s2334_s7 + $0x58] sm:$0xff] }
 0x119   :  { %v875_v16 = vld [vmem:[%s2334_s7 + $0x78] sm:$0xff] }
 0x11a   :  { %v292_v44 = vsel %vm193_vm1, %v290_v38, %v291_v42  ;;  %v464_v46 = vsel %vm202_vm0, %v462_v41, %v463_v43  ;;  %v611_v38 = vld [vmem:[%s2332_s5 + $0x188] sm:$0xff]  ;;  %v1687_v41 = vmov 0.0  }
 0x11b   :  { %1270 = vmatprep.mubr.f32.mxu1 %v292_v44  ;;  %v1573_v39 = vpack.c.bf16 %v611_v38, %v610_v37  ;;  %v630_v38 = vld [vmem:[%s2332_s5 + $0x220] sm:$0xff] }
 0x11c   :  { %1271 = vmatmul.mubr.f32.vlgmr.msra.gmra.mrb[0].mxu1 %v291_v42  ;;  %v1004_v42 = vld [vmem:[%s2331_s4] ss:$0 sm:$0xff] }
 0x11d   :  { %1480 = vmatpush3.bf16.msra.mxu1 %v1871_v60  ;;  %1305 = vmatprep.mubr.msk.f32.mxu1 %vm985_vm3, %v248_v34  ;;  %v264_v60 = vld [vmem:[%s2330_s3 + $0x48] sm:$0xff]  ;;  %v576_v34 = vld [vmem:[%s2332_s5 + $0x70] sm:$0xff] }
 0x11e   :  { %1482 = vmatprep.subr.bf16.mxu1 %v1481_v45  ;;  %v1493_v54 = vpack.c.bf16 %v264_v60, %v263_v53  ;;  %v1575_v53 = vpack.c.bf16 %v595_v48, %v594_v47  ;;  %v1577_v60 = vpack.c.bf16 %v613_v51, %v612_v50  ;;  %v635_v47 = vld [vmem:[%s2332_s5 + $0x248] sm:$0xff]  ;;  %v637_v50 = vld [vmem:[%s2332_s5 + $0x258] sm:$0xff] }
 0x121   :  { %1484 = vmatpush3.bf16.msra.mxu1 %v1481_v45 }
 0x122   :  { %1486 = vmatprep.subr.bf16.mxu1 %v1485_v49 }
 0x125   :  { %1488 = vmatpush3.bf16.msra.mxu1 %v1485_v49 }
 0x126   :  { %1490 = vmatprep.subr.bf16.mxu1 %v1489_v52 }
 0x129   :  { %1492 = vmatpush3.bf16.msra.mxu1 %v1489_v52 }
 0x12a   :  { %1494 = vmatprep.subr.bf16.mxu1 %v1493_v54 }
 0x12d   :  { %1496 = vmatpush3.bf16.msra.mxu1 %v1493_v54  ;;  %v596_v54 = vld [vmem:[%s2332_s5 + $0x110] sm:$0xff] }
 0x12e   :  { %1498 = vmatprep.subr.bf16.mxu1 %v1497_v57  ;;  %v1579_v59 = vpack.c.bf16 %v597_v55, %v596_v54  ;;  %v640_v54 = vld [vmem:[%s2332_s5 + $0x270] sm:$0xff]  ;;  %v641_v55 = vld [vmem:[%s2332_s5 + $0x278] sm:$0xff] }
 0x131   :  { %1500 = vmatpush3.bf16.msra.mxu1 %v1497_v57  ;;  %v614_v57 = vld [vmem:[%s2332_s5 + $0x1a0] sm:$0xff] }
 0x132   :  { %1502 = vmatprep.subr.bf16.mxu1 %v1501_v61 }
 0x135   :  { %1504 = vmatpush3.bf16.msra.mxu1 %v1501_v61  ;;  %v1581_v61 = vpack.c.bf16 %v615_v58, %v614_v57  ;;  %v860_v58 = vld [vmem:[%s2334_s7] sm:$0xff] }
 0x136   :  { %1506 = vmatprep.subr.bf16.mxu1 %v1505_v0 }
 0x139   :  { %1508 = vmatpush3.bf16.msra.mxu1 %v1505_v0  ;;  %v616_v0 = vld [vmem:[%s2332_s5 + $0x1b0] sm:$0xff] }
 0x13a   :  { %1510 = vmatprep.subr.bf16.mxu1 %v1509_v3 }
 0x13c   :  { %1306 = vmatmul.mubr.msk.f32.vlgmr.msra.gmra.mrb[0].mxu1 %vm202_vm0, %v250_v35  ;;  %v577_v35 = vld [vmem:[%s2332_s5 + $0x78] sm:$0xff] }
 0x13d   :  { %1512 = vmatpush3.bf16.msra.mxu1 %v1509_v3  ;;  %1340 = vmatprep.mubr.f32.mxu1 %v464_v46  ;;  %v1571_v36 = vpack.c.bf16 %v577_v35, %v576_v34  ;;  %v1585_v3 = vpack.c.bf16 %v617_v1, %v616_v0  ;;  %v628_v35 = vld [vmem:[%s2332_s5 + $0x210] sm:$0xff]  ;;  %v864_v0 = vld [vmem:[%s2334_s7 + $0x20] sm:$0xff]  ;;  %v865_v1 = vld [vmem:[%s2334_s7 + $0x28] sm:$0xff] }
 0x13e   :  { %1514 = vmatprep.subr.bf16.mxu1 %v1513_v6 }
 0x13f   :  { %1572 = vmatpush3.bf16.msra.mxu0 %v1571_v36  ;;  %v629_v36 = vld [vmem:[%s2332_s5 + $0x218] sm:$0xff] }
 0x140   :  { %1574 = vmatprep.subr.bf16.mxu0 %v1573_v39  ;;  %v1609_v37 = vpack.c.bf16 %v629_v36, %v628_v35  ;;  %v631_v39 = vld [vmem:[%s2332_s5 + $0x228] sm:$0xff] }
 0x141   :  { %1516 = vmatpush3.bf16.msra.mxu1 %v1513_v6  ;;  %v618_v6 = vld [vmem:[%s2332_s5 + $0x1c0] sm:$0xff] }
 0x142   :  { %1518 = vmatprep.subr.bf16.mxu1 %v1517_v9 }
 0x145   :  { %1520 = vmatpush3.bf16.msra.mxu1 %v1517_v9  ;;  %v1589_v9 = vpack.c.bf16 %v619_v7, %v618_v6  ;;  %v868_v6 = vld [vmem:[%s2334_s7 + $0x40] sm:$0xff]  ;;  %v869_v7 = vld [vmem:[%s2334_s7 + $0x48] sm:$0xff] }
 0x146   :  { %1522 = vmatprep.subr.bf16.mxu1 %v1521_v12 }
 0x149   :  { %1524 = vmatpush3.bf16.msra.mxu1 %v1521_v12  ;;  %v620_v12 = vld [vmem:[%s2332_s5 + $0x1d0] sm:$0xff] }
 0x14a   :  { %1526 = vmatprep.subr.bf16.mxu1 %v1525_v15 }
 0x14d   :  { %1528 = vmatpush3.bf16.msra.mxu1 %v1525_v15  ;;  %v1593_v15 = vpack.c.bf16 %v621_v13, %v620_v12  ;;  %v872_v12 = vld [vmem:[%s2334_s7 + $0x60] sm:$0xff]  ;;  %v873_v13 = vld [vmem:[%s2334_s7 + $0x68] sm:$0xff] }
 0x14e   :  { %1530 = vmatprep.subr.bf16.mxu1 %v1529_v18 }
 0x151   :  { %1532 = vmatpush3.bf16.msra.mxu1 %v1529_v18  ;;  %v622_v18 = vld [vmem:[%s2332_s5 + $0x1e0] sm:$0xff] }
 0x152   :  { %1534 = vmatprep.subr.bf16.mxu1 %v1533_v21 }
 0x155   :  { %1536 = vmatpush3.bf16.msra.mxu1 %v1533_v21  ;;  %v1597_v21 = vpack.c.bf16 %v623_v19, %v622_v18 }
 0x156   :  { %1538 = vmatprep.subr.bf16.mxu1 %v1537_v24 }
 0x159   :  { %1540 = vmatpush3.bf16.msra.mxu1 %v1537_v24  ;;  %v624_v24 = vld [vmem:[%s2332_s5 + $0x1f0] sm:$0xff] }
 0x15a   :  { %1629 = vmatprep.subr.bf16.mxu1 %v1685_v40  ;;  %v1601_v27 = vpack.c.bf16 %v625_v25, %v624_v24 }
 0x15c   :  { %1341 = vmatmul.mubr.f32.vlgmr.msra.gmra.mrb[0].mxu1 %v463_v43 }
 0x15d   :  { %1410 = vmatprep.mubr.msk.f32.mxu1 %vm1686_vm4, %v1687_v41 }
 0x22f   :  { %v1342_v43 = vpop.f32.mrb[0].mxu1 }
 0x230   :  { %v2097_v44 = vadd.f32 %v1342_v43, %v1004_v42  ;;  %v533_v45 = vpop.f32.mrb[1].mxu1  ;;  %v632_v43 = vld [vmem:[%s2332_s5 + $0x230] sm:$0xff] }
 0x231   :  { %v551_v46 = vadd.f32 %v1004_v42, %v533_v45  ;;  %v1612_v42 = vpack.c.bf16 %v631_v39, %v630_v38 }
 0x232   :  { %v554_v57 = vmax.f32 %v2097_v44, 0.0 }
 0x233   :  { %v2105_v49 = vmax.f32 %v551_v46, 0.0  ;;  %v634_v46 = vld [vmem:[%s2332_s5 + $0x240] sm:$0xff] }
 0x234   :  { %v1618_v48 = vpack.c.bf16 %v635_v47, %v634_v46 }
 0x235   :  { %v556_v52 = vrot.slane %v2105_v49, 2  ;;  %v560_v56 = vrot.slane %v2105_v49, 6  ;;  %v558_v34 = vrot.slane %v2105_v49, 4 }
 0x237   :  { %713 = vmatprep.mubr.f32.mxu0 %v556_v52  ;;  %v638_v52 = vld [vmem:[%s2332_s5 + $0x260] sm:$0xff] }
 0x238   :  { %714 = vmatmul.mubr.f32.vlgmr.msra.gmra.mrb[10].mxu0 %v2105_v49  ;;  %v636_v49 = vld [vmem:[%s2332_s5 + $0x250] sm:$0xff] }
 0x239   :  { %1576 = vmatpush3.bf16.msra.mxu0 %v1575_v53  ;;  %783 = vmatprep.mubr.f32.mxu0 %v560_v56  ;;  %v1621_v51 = vpack.c.bf16 %v637_v50, %v636_v49  ;;  %v639_v53 = vld [vmem:[%s2332_s5 + $0x268] sm:$0xff]  ;;  %v1627_v56 = vpack.c.bf16 %v641_v55, %v640_v54 }
 0x23a   :  { %1578 = vmatprep.subr.bf16.mxu0 %v1577_v60  ;;  %v1624_v60 = vpack.c.bf16 %v639_v53, %v638_v52 }
 0x23d   :  { %1580 = vmatpush3.bf16.msra.mxu0 %v1579_v59  ;;  %v861_v59 = vld [vmem:[%s2334_s7 + $0x8] sm:$0xff] }
 0x23e   :  { %1582 = vmatprep.subr.bf16.mxu0 %v1581_v61  ;;  %v862_v61 = vld [vmem:[%s2334_s7 + $0x10] sm:$0xff]  ;;  %v1630_v62 = vpack.c.bf16 %v861_v59, %v860_v58 }
 0x23f   :  { %v1633_v44 = vpack.c.bf16 %v863_v63, %v862_v61 }
 0x240   :  { %1631 = vmatpush3.bf16.msra.mxu1 %v1630_v62 }
 0x241   :  { %1584 = vmatpush3.bf16.msra.mxu0 %v1583_v2  ;;  %1632 = vmatprep.subr.bf16.mxu1 %v1685_v40  ;;  %v1636_v2 = vpack.c.bf16 %v865_v1, %v864_v0 }
 0x242   :  { %1586 = vmatprep.subr.bf16.mxu0 %v1585_v3  ;;  %v866_v3 = vld [vmem:[%s2334_s7 + $0x30] sm:$0xff] }
 0x243   :  { %v1639_v5 = vpack.c.bf16 %v867_v4, %v866_v3 }
 0x244   :  { %1634 = vmatpush3.bf16.msra.mxu1 %v1633_v44 }
 0x245   :  { %1588 = vmatpush3.bf16.msra.mxu0 %v1587_v8  ;;  %1635 = vmatprep.subr.bf16.mxu1 %v1685_v40  ;;  %v1642_v8 = vpack.c.bf16 %v869_v7, %v868_v6 }
 0x246   :  { %1590 = vmatprep.subr.bf16.mxu0 %v1589_v9  ;;  %v870_v9 = vld [vmem:[%s2334_s7 + $0x50] sm:$0xff] }
 0x247   :  { %v1645_v11 = vpack.c.bf16 %v871_v10, %v870_v9 }
 0x248   :  { %1637 = vmatpush3.bf16.msra.mxu1 %v1636_v2 }
 0x249   :  { %1592 = vmatpush3.bf16.msra.mxu0 %v1591_v14  ;;  %1638 = vmatprep.subr.bf16.mxu1 %v1685_v40  ;;  %v1648_v14 = vpack.c.bf16 %v873_v13, %v872_v12 }
 0x24a   :  { %1594 = vmatprep.subr.bf16.mxu0 %v1593_v15  ;;  %v874_v15 = vld [vmem:[%s2334_s7 + $0x70] sm:$0xff] }
 0x24b   :  { %v1651_v17 = vpack.c.bf16 %v875_v16, %v874_v15 }
 0x24c   :  { %1640 = vmatpush3.bf16.msra.mxu1 %v1639_v5 }
 0x24d   :  { %1596 = vmatpush3.bf16.msra.mxu0 %v1595_v20  ;;  %1641 = vmatprep.subr.bf16.mxu1 %v1685_v40 }
 0x24e   :  { %1598 = vmatprep.subr.bf16.mxu0 %v1597_v21  ;;  %v1005_v21 = vld [vmem:[%s2333_s6] ss:$0 sm:$0xff]  ;;  %s1661_s6 = scalar_lea.vmem %s961_s16, 32 }
 0x24f   :  { %p1662_p0 = scmp.ne.s32.totalorder %s961_s16, %s1661_s6  ;;  %p1667_p2 = scmp.lt.s32.totalorder %s1661_s6, %s1661_s6 }
 0x250   :  { %1643 = vmatpush3.bf16.msra.mxu1 %v1642_v8 }
 0x251   :  { %1600 = vmatpush3.bf16.msra.mxu0 %v1599_v26  ;;  %1644 = vmatprep.subr.bf16.mxu1 %v1685_v40  ;;  %p1668_p3 = por %p1667_p2, %p1666_p1 }
 0x252   :  { %1602 = vmatprep.subr.bf16.mxu0 %v1601_v27 }
 0x253   :  { %p1669_p4 = pnand %p1668_p3, %p1662_p0 }
 0x254   :  { %1646 = vmatpush3.bf16.msra.mxu1 %v1645_v11 }
 0x255   :  { %1604 = vmatpush3.bf16.msra.mxu0 %v1603_v30  ;;  %1647 = vmatprep.subr.bf16.mxu1 %v1685_v40  ;;  %v1006_v30 = vld [vmem:[%s2335_s8] ss:$0 sm:$0xff] }
 0x256   :  { %1605 = vmatprep.subr.bf16.mxu0 %v1685_v40 }
 0x258   :  { %784 = vmatmul.mubr.f32.vlgmr.msra.gmra.mrb[12].mxu0 %v558_v34  ;;  %1649 = vmatpush3.bf16.msra.mxu1 %v1648_v14 }
 0x259   :  { %1607 = vmatpush3.bf16.msra.mxu0 %v1606_v33  ;;  %1375 = vmatprep.mubr.msk.f32.mxu0 %vm1686_vm4, %v1687_v41  ;;  %v633_v41 = vld [vmem:[%s2332_s5 + $0x238] sm:$0xff] }
 0x25a   :  { %1608 = vmatprep.subr.bf16.mxu0 %v1685_v40  ;;  %v1615_v45 = vpack.c.bf16 %v633_v41, %v632_v43  ;;  %1650 = vmatprep.subr.bf16.mxu1 %v1685_v40 }
 0x25c   :  { %1652 = vmatpush3.bf16.msra.mxu1 %v1651_v17 }
 0x25d   :  { %1610 = vmatpush3.bf16.msra.mxu0 %v1609_v37 }
 0x25e   :  { %1611 = vmatprep.subr.bf16.mxu0 %v1685_v40 }
 0x261   :  { %1613 = vmatpush3.bf16.msra.mxu0 %v1612_v42 }
 0x262   :  { %1614 = vmatprep.subr.bf16.mxu0 %v1685_v40 }
 0x265   :  { %1616 = vmatpush3.bf16.msra.mxu0 %v1615_v45 }
 0x266   :  { %1617 = vmatprep.subr.bf16.mxu0 %v1685_v40 }
 0x269   :  { %1619 = vmatpush3.bf16.msra.mxu0 %v1618_v48 }
 0x26a   :  { %1620 = vmatprep.subr.bf16.mxu0 %v1685_v40 }
 0x26d   :  { %1622 = vmatpush3.bf16.msra.mxu0 %v1621_v51 }
 0x26e   :  { %1623 = vmatprep.subr.bf16.mxu0 %v1685_v40 }
 0x271   :  { %1625 = vmatpush3.bf16.msra.mxu0 %v1624_v60 }
 0x272   :  { %1626 = vmatprep.subr.bf16.mxu0 %v1685_v40 }
 0x275   :  { %1628 = vmatpush3.bf16.msra.mxu0 %v1627_v56 }
 0x278   :  { %1376 = vmatmul.mubr.f32.vlgmr.msra.gmra.mrb[14].mxu0 %v554_v57 }
 0x30b   :  { %v1119_v18 = vpop.f32.mrb[10].mxu0 }
 0x30c   :  { %v1120_v19 = vpop.f32.mrb[11].mxu0 }
 0x30d   :  { %v1121_v20 = vadd.f32 %v1120_v19, %v1119_v18 }
 0x30f   :  { %v716_v40 = vadd.f32 %v1121_v20, %v1005_v21 }
 0x32b   :  { %v1154_v22 = vpop.f32.mrb[12].mxu0 }
 0x32c   :  { %v1155_v23 = vpop.f32.mrb[13].mxu0 }
 0x32d   :  { %v1156_v24 = vadd.f32 %v1155_v23, %v1154_v22 }
 0x32f   :  { %v786_v25 = vadd.f32 %v1156_v24, %v716_v40 }
 0x34b   :  { %v855_v26 = vpop.f32.mrb[14].mxu0 }
 0x34c   :  { %v856_v27 = vadd.f32 %v855_v26, %v786_v25  ;;  %v1377_v28 = vpop.f32.mrb[15].mxu0 }
 0x34e   :  { %v859_v29 = vmax.f32 %v856_v27, 0.0 }
 0x350   :  { %1411 = vmatmul.mubr.f32.vlgmr.msra.gmra.mrb[2].mxu1 %v859_v29 }
 0x423   :  { %v949_v31 = vpop.f32.mrb[2].mxu1 }
 0x424   :  { %v950_v32 = vadd.f32 %v1006_v30, %v949_v31  ;;  %v1412_v33 = vpop.f32.mrb[3].mxu1 }
 0x426   :  { %953 = vst [vmem:[#allocation2] sm:$0x3] %v950_v32 }
 0x427   :  { %1672 = shalt.err (!%p1669_p4)
}
 0x428   :  { %s1673_s19 = scalar_lea.hbm %s2336_s9, 32 }
 0x429   :  { %p1674_p5 = scmp.ne.s32.totalorder %s2336_s9, %s1673_s19  ;;  %p1677_p6 = scmp.lt.u32.totalorder %s1673_s19, %s2336_s9 }
 0x42b   :  { %p1679_p7 = pnand %p1677_p6, %p1674_p5 }
 0x42d   :  { %1682 = shalt.err (!%p1679_p7)
}
 0x42e   :  { %963 = dma.vmem_to_hbm [thread:$0]  %s961_s16, 32, %s2336_s9, [#allocation3]  }
 0x42f   :  { %1683 = dma.done.wait [#allocation3], 32  }
 0x430   :  { %1684 = vsyncadd [#allocation3], 4294967264 }
 0x431   :  { %967 = vsyncpa [#allocation3], 1 }

</bundles_post_ra>
